<compile_context>
chip_gen: v6e
topology: v6e:2x2x1
jax: 0.10.0
libtpu: 0.0.40
codegen_flags: <defaults>
</compile_context>

<pallas_src>
import functools
import math

import jax
import jax.numpy as jnp
from jax.experimental import pallas as pl
from jax.experimental.pallas import tpu as pltpu

FEAT_C = 32       # triplane feature channels (OSGDecoder n_features)
HIDDEN = 64       # OSGDecoder hidden_dim
OUT_C = 3         # decoder_output_dim
SHADE_C = 14      # lr(3)+diffuse(3)+specular(3)+base(3)+gray(1)+alpha(1)


def _pick_tile(m, desired, *, min_grid=1):
    """Largest multiple of 128 that divides `m` and is <= `desired`.

    Falls back to the full dimension (always a legal block shape).  `min_grid`
    best-effort keeps at least that many grid steps along the axis so the
    'parallel' axis can still shard across both TensorCores on v7x.
    """
    if min_grid > 1:
        desired = min(desired, max(128, m // min_grid))
    if m <= desired:
        return m
    t = (min(desired, m) // 128) * 128
    while t >= 128:
        if m % t == 0:
            return t
        t -= 128
    return m


# --------------------------------------------------------------------------
# Pallas kernel 1: OSGDecoder (channel-major end-to-end)
#   plane-sum (1/3 folded into w1) -> transpose once -> FC+Softplus ->
#   fused FC(64, rgb|sigma) -> direct lane-dense (4, TM) row stores.
# --------------------------------------------------------------------------
def osg_decoder_kernel(feat_ref, w1t_ref, b1_ref, w2t_ref, b2_ref, out_ref):
    # feat_ref: (3, TM, C) bf16 triplane samples for TM pixels of one batch elem.
    # Upconvert immediately (v5e has no bf16 VPU/EUP), sum planes (1/3 is in w1).
    xs = jnp.sum(feat_ref[...].astype(jnp.float32), axis=0)           # (TM, C)
    x_cm = xs.T                                                        # (C, TM) — single XLU transpose
    h = jnp.dot(w1t_ref[...], x_cm,
                preferred_element_type=jnp.float32) + b1_ref[...]      # (H, TM)
    h = jax.nn.softplus(h)                                             # lane-dense Softplus
    o = jnp.dot(w2t_ref[...], h,
                preferred_element_type=jnp.float32) + b2_ref[...]      # (4, TM)
    # torch: sigmoid(rgb) * (1 + 2*0.001) - 0.001 ; row 3 = raw sigma
    out_ref[0:3, :] = jax.nn.sigmoid(o[0:3, :]) * (1.0 + 2.0 * 0.001) - 0.001
    out_ref[3:4, :] = o[3:4, :]


def osg_decoder(feat, w1, b1, wc, bc, wd, bd, *, tm=2048):
    """feat: (N, 3, M, C) -> channel-major (N, 4, M); rows 0..2 rgb, row 3 sigma."""
    N, n_planes, M, C = feat.shape
    hidden = w1.shape[1]
    # Fold the 1/n_planes mean into w1; transpose weights for channel-major dots;
    # fuse color|density heads into one (4, hidden) matmul.
    w1t = (w1 / float(n_planes)).T                                     # (hidden, C)
    b1c = b1.reshape(hidden, 1)                                        # (hidden, 1)
    w2t = jnp.concatenate([wc, wd], axis=1).T                          # (4, hidden)
    b2c = jnp.concatenate([bc, bd], axis=1).reshape(OUT_C + 1, 1)      # (4, 1)
    # bf16 feature DMA (kernel is HBM-bound on this read); in the real pipeline
    # the renderer would emit bf16 directly — here this is a no-op if already bf16.
    feat = feat.astype(jnp.bfloat16)
    tm = _pick_tile(M, tm, min_grid=2 if N == 1 else 1)
    return pl.pallas_call(
        osg_decoder_kernel,
        out_shape=jax.ShapeDtypeStruct((N, OUT_C + 1, M), jnp.float32),
        grid_spec=pltpu.PrefetchScalarGridSpec(
            num_scalar_prefetch=0,
            grid=(N, M // tm),
            in_specs=[
                # consume the (N,3,M,C) features in place — no HBM transpose
                pl.BlockSpec((pl.Squeezed(), n_planes, tm, C),
                             lambda b, i: (b, 0, i, 0)),
                pl.BlockSpec((hidden, C), lambda b, i: (0, 0)),
                pl.BlockSpec((hidden, 1), lambda b, i: (0, 0)),
                pl.BlockSpec((OUT_C + 1, hidden), lambda b, i: (0, 0)),
                pl.BlockSpec((OUT_C + 1, 1), lambda b, i: (0, 0)),
            ],
            out_specs=pl.BlockSpec((pl.Squeezed(), OUT_C + 1, tm),
                                   lambda b, i: (b, 0, i)),
        ),
        compiler_params=pltpu.CompilerParams(
            dimension_semantics=("parallel", "parallel"),
            vmem_limit_bytes=32 * 1024 * 1024),
    )(feat, w1t, b1c, w2t, b2c)


# --------------------------------------------------------------------------
# Pallas kernel 2: fused IBL sampling (separable bilinear) + PBR shading
#                  + sRGB compositing
# --------------------------------------------------------------------------
def _linear_to_srgb(x, gamma=2.4):
    x = x / (x + 1.0)
    # abs() kept for parity with the PyTorch reference (x >= 0 after tone map).
    return jnp.where(x <= 0.0031308,
                     x * 12.92,
                     1.055 * jnp.abs(x) ** (1.0 / gamma) - 0.055)


def _interp1d_weights(coord, size, iota):
    """coord: (1, TP) in [-1, 1], align_corners=True.  iota: (size, TP) int32.
    Returns (size, TP) 2-tap linear interpolation weights (one-hot style)."""
    x = (coord + 1.0) * (0.5 * (size - 1))
    x0 = jnp.floor(x)
    wx = x - x0
    x0c = jnp.clip(x0, 0.0, size - 1.0).astype(jnp.int32)
    x1c = jnp.clip(x0 + 1.0, 0.0, size - 1.0).astype(jnp.int32)
    return (jnp.where(iota == x0c, 1.0 - wx, 0.0)
            + jnp.where(iota == x1c, wx, 0.0))


def _env_sample(env_hw, u, v, iota_w, iota_h, env_h, env_w):
    """Separable bilinear env lookup.
    env_hw: (3*env_h, env_w); u,v: (1,TP) az/el coords in [-1,1]. -> (3, TP)."""
    wcol = _interp1d_weights(u, env_w, iota_w)                         # (env_w, TP)
    wrow = _interp1d_weights(v, env_h, iota_h)                         # (env_h, TP)
    ex = jnp.dot(env_hw, wcol, preferred_element_type=jnp.float32)     # (3*env_h, TP)
    chans = []
    for c in range(3):
        chans.append(jnp.sum(ex[c * env_h:(c + 1) * env_h, :] * wrow,
                             axis=0, keepdims=True))                   # (1, TP)
    return jnp.concatenate(chans, axis=0)                              # (3, TP)


def fused_shading_kernel(dec_ref, geom_ref, senv_ref, denv_ref, lut_ref, out_ref,
                         *, metallic, env_h, env_w, lut_w):
    # dec_ref : (4, TP)   rows 0..2 basecolor, row 3 sigma (unused here)
    # geom_ref: (6, TP)   rows: az_n, el_n, az_r, el_r, nDotv, alpha
    # senv_ref/denv_ref: (3*env_h, env_w) env maps of one batch element
    # lut_ref : (2, lut_w) BRDF LUT, row-interpolated host-side (static roughness)
    tp = dec_ref.shape[-1]
    base = dec_ref[0:3, :]
    az_n = geom_ref[0:1, :]
    el_n = geom_ref[1:2, :]
    az_r = geom_ref[2:3, :]
    el_r = geom_ref[3:4, :]
    ndotv = geom_ref[4:5, :]
    alpha = geom_ref[5:6, :]

    # shared iotas for both env lookups (JAX does not CSE broadcast_in_dim)
    iota_ew = jax.lax.broadcasted_iota(jnp.int32, (env_w, tp), 0)
    iota_eh = jax.lax.broadcasted_iota(jnp.int32, (env_h, tp), 0)
    iota_lw = jax.lax.broadcasted_iota(jnp.int32, (lut_w, tp), 0)

    # --- separable bilinear IBL samples (column matmul on MXU + row reduce) ---
    # TODO(synk): for large env maps this should become a DMA gather instead.
    diffuse_sample = _env_sample(denv_ref[...], az_n, el_n,
                                 iota_ew, iota_eh, env_h, env_w)        # (3, TP)
    specular_sample = _env_sample(senv_ref[...], az_r, el_r,
                                  iota_ew, iota_eh, env_h, env_w)       # (3, TP)

    # BRDF LUT: only the u (nDotv) axis is interpolated in-kernel
    u_l = 2.0 * ndotv - 1.0
    w_l = _interp1d_weights(u_l, lut_w, iota_lw)                        # (lut_w, TP)
    lut = jnp.dot(lut_ref[...], w_l, preferred_element_type=jnp.float32)  # (2, TP)
    lut_x = lut[0:1, :]
    lut_y = lut[1:2, :]

    # --- split-sum PBR shading (F90 = 1, as in the reference default path) ---
    diffuse_color = (1.0 - metallic) * base
    base_f0 = 0.04 * (1.0 - metallic) + metallic * base
    diffuse = diffuse_color * diffuse_sample
    spec_color = base_f0 * lut_x + 1.0 * lut_y
    specular = specular_sample * spec_color
    lr = diffuse + specular

    out_ref[0:3, :] = _linear_to_srgb(alpha * lr) * 2.0 - 1.0   # lr_image (bg = 0)
    out_ref[3:6, :] = alpha * diffuse * 2.0 - 1.0               # diffuse
    out_ref[6:9, :] = alpha * specular * 2.0 - 1.0              # specular
    out_ref[9:12, :] = base * 2.0 - 1.0                         # base_color_image
    out_ref[12:13, :] = alpha * ndotv * 2.0 - 1.0               # normal_grayscale
    out_ref[13:14, :] = alpha * 2.0 - 1.0                       # alpha


def fused_shading(dec_cm, geom_cm, senv_hm, denv_hm, lut_1d, *,
                  metallic, env_hw, tp=2048):
    N, _, M = dec_cm.shape
    env_h, env_w = env_hw
    lut_w = lut_1d.shape[-1]
    tp = _pick_tile(M, tp, min_grid=2 if N == 1 else 1)
    kern = functools.partial(fused_shading_kernel, metallic=metallic,
                             env_h=env_h, env_w=env_w, lut_w=lut_w)
    return pl.pallas_call(
        kern,
        out_shape=jax.ShapeDtypeStruct((N, SHADE_C, M), jnp.float32),
        grid_spec=pltpu.PrefetchScalarGridSpec(
            num_scalar_prefetch=0,
            grid=(N, M // tp),
            in_specs=[
                pl.BlockSpec((pl.Squeezed(), 4, tp), lambda b, i: (b, 0, i)),
                pl.BlockSpec((pl.Squeezed(), 6, tp), lambda b, i: (b, 0, i)),
                pl.BlockSpec((pl.Squeezed(), 3 * env_h, env_w),
                             lambda b, i: (b, 0, 0)),
                pl.BlockSpec((pl.Squeezed(), 3 * env_h, env_w),
                             lambda b, i: (b, 0, 0)),
                pl.BlockSpec((2, lut_w), lambda b, i: (0, 0)),
            ],
            out_specs=pl.BlockSpec((pl.Squeezed(), SHADE_C, tp),
                                   lambda b, i: (b, 0, i)),
        ),
        compiler_params=pltpu.CompilerParams(
            dimension_semantics=("parallel", "parallel")),
    )(dec_cm, geom_cm, senv_hm, denv_hm, lut_1d)


# --------------------------------------------------------------------------
# Plain-JAX glue: env-map coordinates (arctan2/arccos kept outside Pallas)
# --------------------------------------------------------------------------
def _azimuth(v3):                                     # (..., 3) -> (...)
    return jnp.arctan2(v3[..., 2], v3[..., 0]) / math.pi


def _elevation(v3):                                   # (..., 3) -> (...)
    return 2.0 * jnp.arccos(jnp.clip(v3[..., 1], -0.9999, 0.9999)) / math.pi - 1.0


# --------------------------------------------------------------------------
# End-to-end translatable portion of TriPlaneGenerator.synthesis
# --------------------------------------------------------------------------
def synthesis(sampled_features, ray_directions, normal_image, weights_samples,
              specular_envmap, diffuse_envmap, brdf_lut, decoder_params,
              shading_kwargs=None):
    shading_kwargs = shading_kwargs or {}
    scale_env = shading_kwargs.get("scale_env", 3.0)
    metallic = shading_kwargs.get("metallic", 0.7)
    roughness = shading_kwargs.get("roughness", 0.2)
    base_alpha = roughness ** 2                       # static Python float

    N, M, _ = ray_directions.shape
    H = W = int(round(math.sqrt(M)))
    env_h, env_w = specular_envmap.shape[-2:]
    lut_h, lut_w = brdf_lut.shape[:2]

    specular_envmap = specular_envmap * scale_env
    diffuse_envmap = diffuse_envmap * scale_env

    # ---- OSGDecoder (Pallas): (N,3,M,C) consumed in place, channel-major out ----
    dec_cm = osg_decoder(sampled_features, *decoder_params)            # (N, 4, M)

    # ---- reflection geometry, built channel-major directly (tiny XLA) ----
    # TODO(synk): joint_bilateral_blur normal filtering (kornia) not reproduced.
    d, n = ray_directions, normal_image
    dp = jnp.sum(-d * n, axis=-1)                                      # (N, M)
    refl = 2.0 * dp[..., None] * n + d
    refl = refl / (jnp.sqrt(jnp.sum(refl * refl, axis=-1, keepdims=True)) + 1e-8)
    ndotv = jnp.clip(dp, 0.0, 1.0)
    geom_cm = jnp.stack([_azimuth(n), _elevation(n),
                         _azimuth(refl), _elevation(refl),
                         ndotv, weights_samples[..., 0]], axis=1)      # (N, 6, M)

    # ---- env maps reshaped (3*h, w); BRDF-LUT row interp pre-folded (static v) ----
    # TODO(synk): PyTorch downsamples (antialiased bilinear) + Gaussian-lowpasses
    # the specular env map before sampling; not reproduced here.
    senv_hm = specular_envmap.reshape(N, 3 * env_h, env_w)
    denv_hm = diffuse_envmap.reshape(N, 3 * env_h, env_w)
    lut_chw = jnp.transpose(brdf_lut[..., :2], (2, 0, 1))              # (2, lut_h, lut_w)
    v_lut = base_alpha * 2.0 - 1.0                                     # grid y, align_corners=True
    y = (v_lut + 1.0) * 0.5 * (lut_h - 1)
    y0 = int(math.floor(y))
    wy = y - y0
    y0c = min(max(y0, 0), lut_h - 1)
    y1c = min(max(y0 + 1, 0), lut_h - 1)
    lut_1d = (1.0 - wy) * lut_chw[:, y0c, :] + wy * lut_chw[:, y1c, :]  # (2, lut_w)

    # ---- fused IBL sampling + PBR shading + sRGB composite (Pallas) ----
    shaded = fused_shading(dec_cm, geom_cm, senv_hm, denv_hm, lut_1d,
                           metallic=metallic, env_hw=(env_h, env_w))

    def nchw(x_cm):                                                    # (N,c,M)->(N,c,H,W)
        return x_cm.reshape(N, x_cm.shape[1], H, W)

    # TODO(synk): superresolution module, kornia mask filtering and
    # background/ground-shadow compositing are not reproduced (modules not provided).
    return {
        "lr_image": nchw(shaded[:, 0:3]),
        "diffuse": nchw(shaded[:, 3:6]),
        "specular": nchw(shaded[:, 6:9]),
        "base_color_image": nchw(shaded[:, 9:12]),
        "normal_grayscale": nchw(shaded[:, 12:13]),
        "alpha": nchw(shaded[:, 13:14]),
        "image_normal": nchw(jnp.transpose(normal_image, (0, 2, 1))),
        "sigma": jnp.transpose(dec_cm[:, 3:4, :], (0, 2, 1)),          # (N, M, 1)
        "rgb": jnp.transpose(dec_cm[:, 0:3, :], (0, 2, 1)),            # (N, M, 3)
        "image_env": _linear_to_srgb(specular_envmap) * 2.0 - 1.0,
    }


# --------------------------------------------------------------------------
if __name__ == "__main__":
    key = jax.random.PRNGKey(0)
    N, H, W = 2, 8, 8
    M = H * W
    ENV_H, ENV_W = 8, 16
    LUT_H = LUT_W = 16

    ks = jax.random.split(key, 12)
    # Synthetic stand-ins for the (untranslated) backbone / importance renderer.
    # The renderer "emits" the feature slab in bf16 (halves the dominant HBM read).
    sampled_features = jax.random.normal(
        ks[0], (N, 3, M, FEAT_C), jnp.float32).astype(jnp.bfloat16)
    ray_directions = jax.random.normal(ks[1], (N, M, 3), jnp.float32)
    ray_directions = ray_directions / jnp.linalg.norm(ray_directions, axis=-1,
                                                      keepdims=True)
    normal_image = jax.random.normal(ks[2], (N, M, 3), jnp.float32)
    normal_image = normal_image / jnp.linalg.norm(normal_image, axis=-1,
                                                  keepdims=True)
    weights_samples = jax.nn.sigmoid(jax.random.normal(ks[3], (N, M, 1), jnp.float32))
    specular_envmap = jnp.abs(jax.random.normal(ks[4], (N, 3, ENV_H, ENV_W),
                                                jnp.float32))
    diffuse_envmap = jnp.abs(jax.random.normal(ks[5], (N, 3, ENV_H, ENV_W),
                                               jnp.float32))
    brdf_lut = jax.nn.sigmoid(jax.random.normal(ks[6], (LUT_H, LUT_W, 3),
                                                jnp.float32))

    # OSGDecoder parameters (FullyConnectedLayer gain = lr_mul / sqrt(fan_in)).
    w1 = jax.random.normal(ks[7], (FEAT_C, HIDDEN), jnp.float32) / math.sqrt(FEAT_C)
    b1 = jnp.zeros((1, HIDDEN), jnp.float32)
    wc = jax.random.normal(ks[8], (HIDDEN, OUT_C), jnp.float32) / math.sqrt(HIDDEN)
    bc = jnp.zeros((1, OUT_C), jnp.float32)
    wd = jax.random.normal(ks[9], (HIDDEN, 1), jnp.float32) / math.sqrt(HIDDEN)
    bd = jnp.zeros((1, 1), jnp.float32)
    decoder_params = (w1, b1, wc, bc, wd, bd)

    results = synthesis(sampled_features, ray_directions, normal_image,
                        weights_samples, specular_envmap, diffuse_envmap,
                        brdf_lut, decoder_params)
    jax.block_until_ready(results["lr_image"])
    jax.block_until_ready(results["sigma"])
    print("KERNEL_OK")
</pallas_src>

<mosaic_0001>
module attributes {stable_mosaic.version = 11 : i64} {
  func.func @osg_decoder_kernel(%arg0: i32, %arg1: i32, %arg2: memref<1x3x64x32xbf16, #tpu.memory_space<vmem>>, %arg3: memref<64x32xf32, #tpu.memory_space<vmem>>, %arg4: memref<64x1xf32, #tpu.memory_space<vmem>>, %arg5: memref<4x64xf32, #tpu.memory_space<vmem>>, %arg6: memref<4x1xf32, #tpu.memory_space<vmem>>, %arg7: memref<1x4x64xf32, #tpu.memory_space<vmem>>) attributes {dimension_semantics = [#tpu.dimension_semantics<parallel>, #tpu.dimension_semantics<parallel>], iteration_bounds = array<i64: 2, 1>, scalar_prefetch = 0 : i64, scratch_operands = 0 : i64, tpu.core_type = #tpu.core_type<tc>, window_params = [{transform_indices = @transform_0, window_bounds = array<i64: 1, 3, 64, 32>}, {pipeline_mode = #tpu.pipeline_mode<synchronous>, transform_indices = @transform_1, window_bounds = array<i64: 64, 32>}, {pipeline_mode = #tpu.pipeline_mode<synchronous>, transform_indices = @transform_2, window_bounds = array<i64: 64, 1>}, {pipeline_mode = #tpu.pipeline_mode<synchronous>, transform_indices = @transform_3, window_bounds = array<i64: 4, 64>}, {pipeline_mode = #tpu.pipeline_mode<synchronous>, transform_indices = @transform_4, window_bounds = array<i64: 4, 1>}, {transform_indices = @transform_5, window_bounds = array<i64: 1, 4, 64>}]} {
    %c0 = arith.constant 0 : index
    %c0_0 = arith.constant 0 : index
    %c0_1 = arith.constant 0 : index
    %c0_2 = arith.constant 0 : index
    %0 = vector.load %arg2[%c0, %c0_0, %c0_1, %c0_2] : memref<1x3x64x32xbf16, #tpu.memory_space<vmem>>, vector<1x3x64x32xbf16>
    %1 = vector.shape_cast %0 : vector<1x3x64x32xbf16> to vector<3x64x32xbf16>
    %2 = arith.extf %1 : vector<3x64x32xbf16> to vector<3x64x32xf32>
    %cst = arith.constant dense<0.000000e+00> : vector<64x32xf32>
    %3 = vector.multi_reduction <add>, %2, %cst [0] : vector<3x64x32xf32> to vector<64x32xf32>
    %4 = tpu.transpose %3, [1, 0] : vector<64x32xf32> -> vector<32x64xf32>
    %c0_3 = arith.constant 0 : index
    %c0_4 = arith.constant 0 : index
    %5 = vector.load %arg3[%c0_3, %c0_4] : memref<64x32xf32, #tpu.memory_space<vmem>>, vector<64x32xf32>
    %cst_5 = arith.constant dense<0.000000e+00> : vector<64x64xf32>
    %6 = tpu.matmul %5, %4, %cst_5 {dimension_numbers = #tpu.dot_dimension_numbers<[1], [0], [0], [1], [0, 0, 1, 1], [], []>} : vector<64x32xf32>, vector<32x64xf32>, vector<64x64xf32> -> vector<64x64xf32>
    %c0_6 = arith.constant 0 : index
    %c0_7 = arith.constant 0 : index
    %7 = vector.load %arg4[%c0_6, %c0_7] : memref<64x1xf32, #tpu.memory_space<vmem>>, vector<64x1xf32>
    %8 = vector.broadcast %7 : vector<64x1xf32> to vector<64x64xf32>
    %9 = arith.addf %6, %8 : vector<64x64xf32>
    %cst_8 = arith.constant 0.000000e+00 : f32
    %10 = vector.broadcast %cst_8 : f32 to vector<64x64xf32>
    %11 = arith.maximumf %9, %10 : vector<64x64xf32>
    %12 = vector.broadcast %cst_8 : f32 to vector<64x64xf32>
    %13 = arith.subf %9, %12 : vector<64x64xf32>
    %14 = arith.cmpf one, %13, %13 : vector<64x64xf32>
    %15 = vector.broadcast %cst_8 : f32 to vector<64x64xf32>
    %16 = arith.addf %9, %15 : vector<64x64xf32>
    %17 = math.absf %13 : vector<64x64xf32>
    %cst_9 = arith.constant 0.000000e+00 : f32
    %18 = vector.broadcast %cst_9 : f32 to vector<64x64xf32>
    %19 = arith.subf %18, %17 : vector<64x64xf32>
    %20 = math.exp %19 : vector<64x64xf32>
    %21 = math.log1p %20 : vector<64x64xf32>
    %22 = arith.addf %11, %21 : vector<64x64xf32>
    %23 = arith.select %14, %16, %22 : vector<64x64xi1>, vector<64x64xf32>
    %c0_10 = arith.constant 0 : index
    %c0_11 = arith.constant 0 : index
    %24 = vector.load %arg5[%c0_10, %c0_11] : memref<4x64xf32, #tpu.memory_space<vmem>>, vector<4x64xf32>
    %cst_12 = arith.constant dense<0.000000e+00> : vector<4x64xf32>
    %25 = tpu.matmul %24, %23, %cst_12 {dimension_numbers = #tpu.dot_dimension_numbers<[1], [0], [0], [1], [0, 0, 1, 1], [], []>} : vector<4x64xf32>, vector<64x64xf32>, vector<4x64xf32> -> vector<4x64xf32>
    %c0_13 = arith.constant 0 : index
    %c0_14 = arith.constant 0 : index
    %26 = vector.load %arg6[%c0_13, %c0_14] : memref<4x1xf32, #tpu.memory_space<vmem>>, vector<4x1xf32>
    %27 = vector.broadcast %26 : vector<4x1xf32> to vector<4x64xf32>
    %28 = arith.addf %25, %27 : vector<4x64xf32>
    %29 = vector.extract_strided_slice %28 {offsets = [0, 0], sizes = [3, 64], strides = [1, 1]} : vector<4x64xf32> to vector<3x64xf32>
    %30 = arith.negf %29 : vector<3x64xf32>
    %31 = math.exp %30 : vector<3x64xf32>
    %cst_15 = arith.constant 1.000000e+00 : f32
    %32 = vector.broadcast %cst_15 : f32 to vector<3x64xf32>
    %33 = arith.addf %32, %31 : vector<3x64xf32>
    %34 = arith.divf %32, %33 : vector<3x64xf32>
    %cst_16 = arith.constant 1.002000e+00 : f32
    %35 = vector.broadcast %cst_16 : f32 to vector<3x64xf32>
    %36 = arith.mulf %34, %35 : vector<3x64xf32>
    %cst_17 = arith.constant 1.000000e-03 : f32
    %37 = vector.broadcast %cst_17 : f32 to vector<3x64xf32>
    %38 = arith.subf %36, %37 : vector<3x64xf32>
    %c0_18 = arith.constant 0 : index
    %c0_19 = arith.constant 0 : index
    %c0_20 = arith.constant 0 : index
    %39 = vector.load %arg7[%c0_18, %c0_19, %c0_20] : memref<1x4x64xf32, #tpu.memory_space<vmem>>, vector<1x3x64xf32>
    %40 = vector.shape_cast %39 : vector<1x3x64xf32> to vector<3x64xf32>
    %41 = vector.shape_cast %38 : vector<3x64xf32> to vector<1x3x64xf32>
    tpu.vector_store %arg7[%c0_18, %c0_19, %c0_20], %41 {strides = array<i32>} : memref<1x4x64xf32, #tpu.memory_space<vmem>>, vector<1x3x64xf32>,
    %42 = vector.extract_strided_slice %28 {offsets = [3, 0], sizes = [1, 64], strides = [1, 1]} : vector<4x64xf32> to vector<1x64xf32>
    %c0_21 = arith.constant 0 : index
    %c3 = arith.constant 3 : index
    %c0_22 = arith.constant 0 : index
    %43 = vector.load %arg7[%c0_21, %c3, %c0_22] : memref<1x4x64xf32, #tpu.memory_space<vmem>>, vector<1x1x64xf32>
    %44 = vector.shape_cast %43 : vector<1x1x64xf32> to vector<1x64xf32>
    %45 = vector.shape_cast %42 : vector<1x64xf32> to vector<1x1x64xf32>
    tpu.vector_store %arg7[%c0_21, %c3, %c0_22], %45 {strides = array<i32>} : memref<1x4x64xf32, #tpu.memory_space<vmem>>, vector<1x1x64xf32>,
    return
  }
  func.func @transform_0(%arg0: i32, %arg1: i32) -> (i32, i32, i32, i32) {
    %c0_i32 = arith.constant 0 : i32
    %c0_i32_0 = arith.constant 0 : i32
    %c0_i32_1 = arith.constant 0 : i32
    return %arg0, %c0_i32, %arg1, %c0_i32_0 : i32, i32, i32, i32
  }
  func.func @transform_1(%arg0: i32, %arg1: i32) -> (i32, i32) {
    %c0_i32 = arith.constant 0 : i32
    %c0_i32_0 = arith.constant 0 : i32
    %c0_i32_1 = arith.constant 0 : i32
    return %c0_i32, %c0_i32_0 : i32, i32
  }
  func.func @transform_2(%arg0: i32, %arg1: i32) -> (i32, i32) {
    %c0_i32 = arith.constant 0 : i32
    %c0_i32_0 = arith.constant 0 : i32
    %c0_i32_1 = arith.constant 0 : i32
    return %c0_i32, %c0_i32_0 : i32, i32
  }
  func.func @transform_3(%arg0: i32, %arg1: i32) -> (i32, i32) {
    %c0_i32 = arith.constant 0 : i32
    %c0_i32_0 = arith.constant 0 : i32
    %c0_i32_1 = arith.constant 0 : i32
    return %c0_i32, %c0_i32_0 : i32, i32
  }
  func.func @transform_4(%arg0: i32, %arg1: i32) -> (i32, i32) {
    %c0_i32 = arith.constant 0 : i32
    %c0_i32_0 = arith.constant 0 : i32
    %c0_i32_1 = arith.constant 0 : i32
    return %c0_i32, %c0_i32_0 : i32, i32
  }
  func.func @transform_5(%arg0: i32, %arg1: i32) -> (i32, i32, i32) {
    %c0_i32 = arith.constant 0 : i32
    %c0_i32_0 = arith.constant 0 : i32
    return %arg0, %c0_i32, %arg1 : i32, i32, i32
  }
}

</mosaic_0001>

<bundles_post_ra>
// kernel: tpu_custom_call.1
= control target key start
LH: loop header
LB: loop body
LE: loop exit
PB: predicated region body
PF: predicated region fallthrough
CT: control target
= control target key end

     0   :  { %10 = vsyncpa [#allocation3], 0  ;;  %s1597_s0 = inlined_call_operand.vmem [shape: bf16[2,3,64,32], index: 0, kind: input, shape index: {}]   ;;  %s1598_s1 = inlined_call_operand.vmem [shape: f32[64,32], index: 1, kind: input, shape index: {}]   ;;  %s1599_s2 = inlined_call_operand.vmem [shape: f32[64,1], index: 2, kind: input, shape index: {}]   ;;  %s1600_s3 = inlined_call_operand.vmem [shape: f32[4,64], index: 3, kind: input, shape index: {}]   ;;  %s1601_s4 = inlined_call_operand.vmem [shape: f32[4,1], index: 4, kind: input, shape index: {}]   ;;  %s1602_s5 = inlined_call_operand.hbm [shape: f32[2,4,64], index: 5, kind: output, shape index: {}]  }
   0x1   :  { %12 = vsyncpa [#allocation3 + $0x1], 0  ;;  %s1247_s18 = smov 0   ;;  %s1249_s19 = smov 0  }
   0x2   :  { %s1251_s20 = smov 0   ;;  %s1253_s21 = smov 0  }
   0x3   :  { %s1255_s22 = smov 0   ;;  %s1257_s23 = smov 0  }
   0x4 LB: > { %s877_s24 = sadd.s32 4294967295, %s1211_s23   ;;  %s878_s25 = sadd.s32 4294967294, %s1211_s23   ;;  %s1211_s23 = sphi %s1257_s23, %s18_s23   ;;  %s1207_s22 = sphi %s1255_s22, %s1617_s22   ;;  %s1203_s21 = sphi %s1253_s21, %s1616_s21   ;;  %s1199_s20 = sphi %s1251_s20, %s1615_s20   ;;  %s1195_s19 = sphi %s1249_s19, %s1614_s19   ;;  %s1191_s18 = sphi %s1247_s18, %s1613_s18  }
   0x5   : > { %s30_s26 = sadd.s32 1, %s1207_s22  ;;  %s151_s27 = sadd.s32 1, %s1199_s20 }
   0x6   : > { %p32_p0 = scmp.ge.s32.totalorder %s30_s26, 2  ;;  %p161_p1 = scmp.ne.s32.totalorder %s1199_s20, %s1195_s19 }
   0x7   : > { %p162_p2 = scmp.eq.s32.totalorder %s877_s24, 1  ;;  %p167_p3 = scmp.ne.s32.totalorder %s1195_s19, %s1191_s18 }
   0x8   : > { %s1619_s26 = smov (%p32_p0, %s30_s26), 0  ;;  %p168_p5 = scmp.eq.s32.totalorder %s878_s25, 1 }
   0x9   : > { %p1287_p4 = por %p162_p2, %p161_p1  ;;  %s146_s29 = ssub.s32 %s1207_s22, %s1619_s26 }
   0xa   : > { %p881_p6 = scmp.ge.s32.totalorder %s1211_s23, 1  ;;  %p149_p7 = scmp.eq.s32.totalorder %s146_s29, 0 }
   0xb   : > { %p1294_p8 = por %p168_p5, %p167_p3  ;;  %p211_p9 = scmp.lt.s32.totalorder %s1211_s23, 3 }
   0xc   : > { %s1300_s6 = scalar_select %p149_p7, %s1199_s20, %s151_s27  }
   0xd   : > { %p212_p10 = pnand %p881_p6, %p211_p9 }
   0xe   : > { %p244_p11 = scmp.lt.s32.totalorder (!%p212_p10), %s1203_s21, 1  ;;  %s240_s24 = sand.u32 (!%p212_p10), 1, %s1195_s19  }
   0xf   : > { %215 = sbr.rel (%p212_p10) target bundleno = 574 (0x23e), region = 40  ;;  %s882_s25 = sshll.u32 (!%p212_p10), %s240_s24, 2 }
  0x10   : > { %s242_s27 = scalar_lea.vmem (!%p212_p10), [#allocation2], %s882_s25  ;;  %s789_s11 = scalar_lea.sflag (!%p212_p10), [#allocation3], %s240_s24 }
  0x11   : > { %s803_s7 = sshll.u32 (!%p212_p10), %s242_s27, 4  ;;  %s1216_s13 = smov (!%p212_p10), [#allocation2]   ;;  %s804_s7 = int_to_ptr.vmem [resolvable:$true] %s803_s7 }
  0x12   : > { %s1135_s12 = scalar_lea.vmem (!%p212_p10), %s804_s7, 64 }
  0x13   : > { %p1136_p12 = scmp.ne.s32.totalorder (!%p212_p10), %s804_s7, %s1135_s12 }
  0x14   : > { %vm301_vm0 = vcmask 261120   ;;  %v342_v0 = vld [vmem:[%s1598_s1] sm:$0xff]  ;;  %v1213_v1 = vmov 0   ;;  %s245_s9 = scalar_select %p244_p11, %s1203_s21, 1  ;;  %v357_v2 = vld [vmem:[%s1599_s2 + $0x38] sm:$0xff]  ;;  %v355_v3 = vld [vmem:[%s1599_s2 + $0x28] sm:$0xff] }
  0x15   : > { %1007 = vmatprep.mubr.msk.f32.mxu0 %vm301_vm0, %v342_v0  ;;  %1097 = vset.pattern.permute.xlu0 %v1213_v1  ;;  %v356_v4 = vld [vmem:[%s1599_s2 + $0x30] sm:$0xff]  ;;  %v354_v5 = vld [vmem:[%s1599_s2 + $0x20] sm:$0xff]  ;;  %v353_v15 = vld [vmem:[%s1599_s2 + $0x18] sm:$0xff]  ;;  %vm1215_vm1 = vmmov 0   ;;  %p1137_p13 = pnand %p1136_p12, %p1287_p4 }
  0x16   : > { %1098 = vset.pattern.permute.xlu1 %v1213_v1  ;;  %395 = vperm.xlu0 %1097, %v357_v2   ;;  %s1038_s14 = smul.u32 96, %s245_s9  ;;  %v352_v21 = vld [vmem:[%s1599_s2 + $0x10] sm:$0xff]  ;;  %v351_v36 = vld [vmem:[%s1599_s2 + $0x8] sm:$0xff]  ;;  %v350_v41 = vld [vmem:[%s1599_s2] sm:$0xff] }
  0x17   : > { %385 = vperm.xlu1 %1098, %v355_v3   ;;  %v696_v49 = vld [vmem:[%s1601_s4] sm:$0xf]  ;;  %p1138_p0 = pneg %p1137_p13 }
  0x18   : > { %s1323_s29 = scalar_lea.vmem %s1597_s0, %s1038_s14  ;;  %s1139_s14 = sshll.u32 %s1216_s13, 4  ;;  %s1140_s14 = int_to_ptr.vmem [resolvable:$false] %s1139_s14 }
  0x19   : > { %v957_v6 = vld [vmem:[%s1323_s29 + $0x18] sm:$0xff]   ;;  %v956_v13 = vld [vmem:[%s1323_s29 + $0x10] sm:$0xff]   ;;  %v955_v30 = vld [vmem:[%s1323_s29 + $0x8] sm:$0xff]   ;;  %p1142_p1 = scmp.lt.s32.totalorder %s804_s7, %s1140_s14 }
  0x1a   : > { %v961_v7 = vld [vmem:[%s1323_s29 + $0x38] sm:$0xff]   ;;  %390 = vperm.xlu0 %1097, %v356_v4   ;;  %v921_v9 = vunpack.c.l.bf16 %v957_v6  ;;  %v922_v10 = vunpack.c.h.bf16 %v957_v6  ;;  %v960_v14 = vld [vmem:[%s1323_s29 + $0x30] sm:$0xff]   ;;  %v918_v18 = vunpack.c.h.bf16 %v956_v13  ;;  %v917_v34 = vunpack.c.l.bf16 %v956_v13  ;;  %v959_v35 = vld [vmem:[%s1323_s29 + $0x28] sm:$0xff]  }
  0x1b   : > { %v965_v8 = vld [vmem:[%s1323_s29 + $0x58] sm:$0xff]   ;;  %v937_v11 = vunpack.c.l.bf16 %v961_v7  ;;  %v938_v12 = vunpack.c.h.bf16 %v961_v7  ;;  %380 = vperm.xlu1 %1098, %v354_v5   ;;  %v934_v19 = vunpack.c.h.bf16 %v960_v14  ;;  %v964_v20 = vld [vmem:[%s1323_s29 + $0x50] sm:$0xff]   ;;  %v933_v40 = vunpack.c.l.bf16 %v960_v14  ;;  %v963_v46 = vld [vmem:[%s1323_s29 + $0x48] sm:$0xff]  }
  0x1c   : > { %v953_v16 = vunpack.c.l.bf16 %v965_v8  ;;  %v954_v17 = vunpack.c.h.bf16 %v965_v8  ;;  %v337_v22 = vsel %vm301_vm0, %v922_v10, 0.0  ;;  %v332_v24 = vsel %vm301_vm0, %v921_v9, 0.0  ;;  %v908_v58 = vld [vmem:[%s1323_s29] sm:$0xff]  }
  0x1d   : > { %v338_v23 = vsel %vm301_vm0, %v938_v12, 0.0  ;;  %v333_v25 = vsel %vm301_vm0, %v937_v11, 0.0  ;;  %v950_v31 = vunpack.c.h.bf16 %v964_v20  ;;  %v327_v32 = vsel %vm301_vm0, %v918_v18, 0.0  ;;  %v958_v59 = vld [vmem:[%s1323_s29 + $0x20] sm:$0xff]  }
  0x1e   : > { %v339_v26 = vadd.f32 %v338_v23, %v337_v22  ;;  %v340_v27 = vsel %vm301_vm0, %v954_v17, 0.0  ;;  %v334_v28 = vadd.f32 %v333_v25, %v332_v24  ;;  %v335_v29 = vsel %vm301_vm0, %v953_v16, 0.0  ;;  %375 = vperm.xlu0 %1097, %v353_v15   ;;  %v962_v4 = vld [vmem:[%s1323_s29 + $0x40] sm:$0xff]   ;;  %v343_v23 = vld [vmem:[%s1598_s1 + $0x8] sm:$0xff]  ;;  %v344_v24 = vld [vmem:[%s1598_s1 + $0x10] sm:$0xff]  ;;  %s904_s29 = sshll.u32 %s1203_s21, 6 }
  0x1f   : > { %v328_v33 = vsel %vm301_vm0, %v934_v19, 0.0  ;;  %370 = vperm.xlu1 %1098, %v352_v21   ;;  %v330_v42 = vsel %vm301_vm0, %v950_v31, 0.0  ;;  %v949_v43 = vunpack.c.l.bf16 %v964_v20  ;;  %v322_v44 = vsel %vm301_vm0, %v917_v34, 0.0  ;;  %v345_v25 = vld [vmem:[%s1598_s1 + $0x18] sm:$0xff]  ;;  %s801_s10 = scalar_lea.hbm %s1602_s5, %s904_s29  ;;  %s1141_s21 = scalar_lea.vmem %s1140_s14, 128 }
  0x20   : > { %v341_v37 = vadd.f32 %v340_v27, %v339_v26  ;;  %v336_v38 = vadd.f32 %v335_v29, %v334_v28  ;;  %v329_v39 = vadd.f32 %v328_v33, %v327_v32  ;;  %v914_v45 = vunpack.c.h.bf16 %v955_v30  ;;  %v346_v26 = vld [vmem:[%s1598_s1 + $0x20] sm:$0xff]  ;;  %v347_v27 = vld [vmem:[%s1598_s1 + $0x28] sm:$0xff]  ;;  %v348_v28 = vld [vmem:[%s1598_s1 + $0x30] sm:$0xff]  ;;  %p1143_p2 = scmp.lt.s32.totalorder %s1141_s21, %s1135_s12 }
  0x21   : > { %v323_v47 = vsel %vm301_vm0, %v933_v40, 0.0  ;;  %v930_v48 = vunpack.c.h.bf16 %v959_v35  ;;  %v325_v52 = vsel %vm301_vm0, %v949_v43, 0.0  ;;  %v946_v53 = vunpack.c.h.bf16 %v963_v46  ;;  %v349_v29 = vld [vmem:[%s1598_s1 + $0x38] sm:$0xff] }
  0x22   : > { %991 = vmatprep.subr.msk.mxu0 %vm301_vm0, %v341_v37  ;;  %365 = vperm.xlu0 %1097, %v351_v36   ;;  %v331_v50 = vadd.f32 %v330_v42, %v329_v39  ;;  %v324_v51 = vadd.f32 %v323_v47, %v322_v44  ;;  %v317_v54 = vsel %vm301_vm0, %v914_v45, 0.0  ;;  %v913_v56 = vunpack.c.l.bf16 %v955_v30  ;;  %p1144_p3 = por %p1143_p2, %p1142_p1 }
  0x23   : > { %992 = vmatpush3.xpose.msk.msra.mxu0 %vm301_vm0, %v341_v37  ;;  %360 = vperm.xlu1 %1098, %v350_v41   ;;  %v318_v55 = vsel %vm301_vm0, %v930_v48, 0.0  ;;  %v929_v57 = vunpack.c.l.bf16 %v959_v35  ;;  %v320_v62 = vsel %vm301_vm0, %v946_v53, 0.0  ;;  %v945_v63 = vunpack.c.l.bf16 %v963_v46 }
  0x24   : > { %993 = vmatprep.subr.msk.mxu0 %vm301_vm0, %v336_v38  ;;  %v326_v60 = vadd.f32 %v325_v52, %v324_v51  ;;  %v319_v61 = vadd.f32 %v318_v55, %v317_v54  ;;  %v312_v0 = vsel %vm301_vm0, %v913_v56, 0.0  ;;  %v910_v2 = vunpack.c.h.bf16 %v908_v58  ;;  %p1145_p5 = pnand %p1144_p3, %p1138_p0 }
  0x25   : > { %v313_v1 = vsel %vm301_vm0, %v929_v57, 0.0  ;;  %v926_v3 = vunpack.c.h.bf16 %v958_v59  ;;  %v315_v7 = vsel %vm301_vm0, %v945_v63, 0.0  ;;  %v942_v8 = vunpack.c.h.bf16 %v962_v4 }
  0x26   : > { %699 = vperm.xlu0 %1097, %v696_v49   ;;  %v321_v5 = vadd.f32 %v320_v62, %v319_v61  ;;  %v314_v6 = vadd.f32 %v313_v1, %v312_v0  ;;  %v307_v9 = vsel %vm301_vm0, %v910_v2, 0.0  ;;  %v909_v11 = vunpack.c.l.bf16 %v908_v58 }
  0x27   : > { %994 = vmatpush3.xpose.msk.msra.mxu0 %vm301_vm0, %v336_v38  ;;  %v308_v10 = vsel %vm301_vm0, %v926_v3, 0.0  ;;  %v925_v12 = vunpack.c.l.bf16 %v958_v59  ;;  %v310_v15 = vsel %vm301_vm0, %v942_v8, 0.0  ;;  %v941_v16 = vunpack.c.l.bf16 %v962_v4 }
  0x28   : > { %995 = vmatprep.subr.msk.mxu0 %vm301_vm0, %v331_v50  ;;  %v316_v13 = vadd.f32 %v315_v7, %v314_v6  ;;  %v309_v14 = vadd.f32 %v308_v10, %v307_v9  ;;  %v302_v17 = vsel %vm301_vm0, %v909_v11, 0.0  ;;  %v1214_v30 = vmov 0.0  }
  0x29   : > { %v303_v18 = vsel %vm301_vm0, %v925_v12, 0.0  ;;  %v305_v21 = vsel %vm301_vm0, %v941_v16, 0.0  ;;  %1019 = vmatprep.subr.mxu1 %v1214_v30  ;;  %1035 = vmatprep.mubr.msk.f32.mxu1 %vm1215_vm1, %v1214_v30 }
  0x2a   : > { %v311_v19 = vadd.f32 %v310_v15, %v309_v14  ;;  %v304_v20 = vadd.f32 %v303_v18, %v302_v17 }
  0x2b   : > { %996 = vmatpush3.xpose.msk.msra.mxu0 %vm301_vm0, %v331_v50 }
  0x2c   : > { %997 = vmatprep.subr.msk.mxu0 %vm301_vm0, %v326_v60  ;;  %v306_v22 = vadd.f32 %v305_v21, %v304_v20 }
  0x2f   : > { %998 = vmatpush3.xpose.msk.msra.mxu0 %vm301_vm0, %v326_v60 }
  0x30   : > { %999 = vmatprep.subr.msk.mxu0 %vm301_vm0, %v321_v5 }
  0x33   : > { %1000 = vmatpush3.xpose.msk.msra.mxu0 %vm301_vm0, %v321_v5 }
  0x34   : > { %1001 = vmatprep.subr.msk.mxu0 %vm301_vm0, %v316_v13 }
  0x37   : > { %1002 = vmatpush3.xpose.msk.msra.mxu0 %vm301_vm0, %v316_v13 }
  0x38   : > { %1003 = vmatprep.subr.msk.mxu0 %vm301_vm0, %v311_v19 }
  0x3b   : > { %1004 = vmatpush3.xpose.msk.msra.mxu0 %vm301_vm0, %v311_v19 }
  0x3c   : > { %1005 = vmatprep.subr.msk.mxu0 %vm301_vm0, %v306_v22 }
  0x3f   : > { %1006 = vmatpush3.xpose.msk.msra.mxu0 %vm301_vm0, %v306_v22 }
  0x42   : > { %1008 = vmatmul.mubr.msk.f32.vlgmr.msra.gmra.mxu0 %vm301_vm0, %v343_v23 }
  0x43   : > { %1010 = vmatprep.mubr.msk.f32.mxu0 %vm301_vm0, %v344_v24 }
  0x46   : > { %1011 = vmatmul.mubr.msk.f32.gmra.mxu0 %vm301_vm0, %v345_v25 }
  0x47   : > { %1013 = vmatprep.mubr.msk.f32.mxu0 %vm301_vm0, %v346_v26 }
  0x4a   : > { %1014 = vmatmul.mubr.msk.f32.gmra.mxu0 %vm301_vm0, %v347_v27 }
  0x4b   : > { %1016 = vmatprep.mubr.msk.f32.mxu0 %vm301_vm0, %v348_v28 }
  0x4e   : > { %1017 = vmatmul.mubr.msk.f32.gmra.mxu0 %vm301_vm0, %v349_v29 }
  0x91   : > { %v396_v31 = vpop.permute.xlu0 %395 }
  0x92   : > { %v386_v32 = vpop.permute.xlu1 %385 }
  0x95   : > { %v391_v33 = vpop.permute.xlu0 %390 }
  0x96   : > { %v381_v34 = vpop.permute.xlu1 %380 }
  0x99   : > { %v376_v35 = vpop.permute.xlu0 %375 }
  0x9a   : > { %v371_v36 = vpop.permute.xlu1 %370 }
  0x9d   : > { %v366_v38 = vpop.permute.xlu0 %365 }
  0x9e   : > { %v361_v40 = vpop.permute.xlu1 %360 }
 0x102   : > { %v1009_v37 = vpop.f32.mrf.mxu0 }
 0x103   : > { %v1422_v41 = vadd.f32 %v1009_v37, %v366_v38 }
 0x104   : > { %v512_v39 = vpop.f32.mrf.mxu0 }
 0x105   : > { %v1426_v44 = vadd.f32 %v512_v39, %v361_v40  ;;  %v576_v48 = vand.u32 2147483647, %v1422_v41  ;;  %vm560_vm0 = vcmp.ne.f32.partialorder %v1422_v41, %v1422_v41 }
 0x106   : > { %v1012_v42 = vpop.f32.mrf.mxu0 }
 0x107   : > { %v1424_v43 = vadd.f32 %v1012_v42, %v376_v35  ;;  %v575_v52 = vand.u32 2147483647, %v1426_v44  ;;  %v584_v57 = vsub.f32 0.0, %v576_v48  ;;  %vm559_vm1 = vcmp.ne.f32.partialorder %v1426_v44, %v1426_v44 }
 0x108   : > { %v522_v45 = vpop.f32.mrf.mxu0 }
 0x109   : > { %v578_v46 = vand.u32 2147483647, %v1424_v43  ;;  %v1429_v47 = vadd.f32 %v522_v45, %v371_v36  ;;  %v583_v0 = vsub.f32 0.0, %v575_v52  ;;  %v593_v6 = vmul.f32 1.442695, %v584_v57 }
 0x10a   : > { %v1015_v49 = vpop.f32.mrf.mxu0  ;;  %v554_v37 = vmax.f32 %v1424_v43, 0.0  ;;  %vm562_vm14 = vcmp.ne.f32.partialorder %v1424_v43, %v1424_v43 }
 0x10b   : > { %v586_v50 = vsub.f32 0.0, %v578_v46  ;;  %v577_v51 = vand.u32 2147483647, %v1429_v47  ;;  %v1434_v53 = vadd.f32 %v1015_v49, %v386_v32  ;;  %v591_v11 = vmul.f32 1.442695, %v583_v0 }
 0x10c   : > { %v532_v54 = vpop.f32.mrf.mxu0  ;;  %vm561_vm15 = vcmp.ne.f32.partialorder %v1429_v47, %v1429_v47 }
 0x10d   : > { %v585_v55 = vsub.f32 0.0, %v577_v51  ;;  %v1436_v56 = vadd.f32 %v532_v54, %v381_v34  ;;  %v597_v58 = vmul.f32 1.442695, %v586_v50  ;;  %v580_v59 = vand.u32 2147483647, %v1434_v53 }
 0x10e   : > { %v1018_v60 = vpop.f32.mrf.mxu0  ;;  %v556_v36 = vmax.f32 %v1434_v53, 0.0  ;;  %vm564_vm10 = vcmp.ne.f32.partialorder %v1434_v53, %v1434_v53 }
 0x10f   : > { %v595_v61 = vmul.f32 1.442695, %v585_v55  ;;  %v579_v62 = vand.u32 2147483647, %v1436_v56  ;;  %v1440_v63 = vadd.f32 %v1018_v60, %v396_v31  ;;  %v588_v1 = vsub.f32 0.0, %v580_v59 }
 0x110   : > { %v542_v2 = vpop.f32.mrf.mxu0  ;;  %1099 = vpow2.f32 %v597_v58  ;;  %v555_v40 = vmax.f32 %v1436_v56, 0.0  ;;  %vm563_vm12 = vcmp.ne.f32.partialorder %v1436_v56, %v1436_v56 }
 0x111   : > { %v587_v3 = vsub.f32 0.0, %v579_v62  ;;  %v582_v4 = vand.u32 2147483647, %v1440_v63  ;;  %v1443_v5 = vadd.f32 %v542_v2, %v391_v33  ;;  %v601_v7 = vmul.f32 1.442695, %v588_v1 }
 0x112   : > { %1101 = vpow2.f32 %v595_v61  ;;  %v558_v39 = vmax.f32 %v1440_v63, 0.0  ;;  %vm566_vm2 = vcmp.ne.f32.partialorder %v1440_v63, %v1440_v63 }
 0x113   : > { %v599_v8 = vmul.f32 1.442695, %v587_v3  ;;  %v590_v9 = vsub.f32 0.0, %v582_v4  ;;  %v581_v10 = vand.u32 2147483647, %v1443_v5  ;;  %1103 = vpow2.f32 %v601_v7 }
 0x114   : > { %v557_v49 = vmax.f32 %v1443_v5, 0.0  ;;  %vm565_vm3 = vcmp.ne.f32.partialorder %v1443_v5, %v1443_v5 }
 0x115   : > { %1105 = vpow2.f32 %v599_v8  ;;  %v605_v12 = vmul.f32 1.442695, %v590_v9  ;;  %v589_v13 = vsub.f32 0.0, %v581_v10 }
 0x116   : > { %1107 = vpow2.f32 %v593_v6 }
 0x117   : > { %1109 = vpow2.f32 %v605_v12  ;;  %v603_v14 = vmul.f32 1.442695, %v589_v13 }
 0x118   : > { %1111 = vpow2.f32 %v591_v11 }
 0x119   : > { %1113 = vpow2.f32 %v603_v14 }
 0x11d   : > { %v1446_v15 = vpop.eup %1099 }
 0x11e   : > { %v634_v20 = vadd.f32 1.0, %v1446_v15  ;;  %v637_v42 = vmul.f32 -0.5, %v1446_v15  ;;  %v640_v61 = vand.u32 2147483647, %v1446_v15 }
 0x11f   : > { %v1448_v16 = vpop.eup %1101 }
 0x120   : > { %v1450_v17 = vpop.eup %1103  ;;  %v625_v24 = vadd.f32 1.0, %v1448_v16  ;;  %v628_v45 = vmul.f32 -0.5, %v1448_v16  ;;  %v638_v4 = vadd.f32 1.0, %v637_v42  ;;  %vm1503_vm8 = vcmp.lt.f32.partialorder %v640_v61, 0.0004427343 }
 0x121   : > { %v652_v19 = vadd.f32 1.0, %v1450_v17  ;;  %v655_v33 = vmul.f32 -0.5, %v1450_v17  ;;  %v658_v57 = vand.u32 2147483647, %v1450_v17  ;;  %v695_v61 = vld [vmem:[%s1600_s3] sm:$0xf] }
 0x122   : > { %v1452_v18 = vpop.eup %1105  ;;  %v629_v6 = vadd.f32 1.0, %v628_v45 }
 0x123   : > { %v1456_v21 = vpop.eup %1107  ;;  %v643_v22 = vadd.f32 1.0, %v1452_v18  ;;  %1115 = vlog2.f32 %v652_v19  ;;  %v646_v35 = vmul.f32 -0.5, %v1452_v18  ;;  %v656_v50 = vadd.f32 1.0, %v655_v33 }
 0x124   : > { %v1110_v23 = vpop.eup %1109  ;;  %v616_v29 = vadd.f32 1.0, %v1456_v21  ;;  %v619_v38 = vmul.f32 -0.5, %v1456_v21  ;;  %v622_v51 = vand.u32 2147483647, %v1456_v21  ;;  %v649_v3 = vand.u32 2147483647, %v1452_v18 }
 0x125   : > { %v1460_v25 = vpop.eup %1111  ;;  %v670_v26 = vadd.f32 1.0, %v1110_v23  ;;  %1117 = vlog2.f32 %v643_v22  ;;  %v673_v32 = vmul.f32 -0.5, %v1110_v23  ;;  %v676_v54 = vand.u32 2147483647, %v1110_v23 }
 0x126   : > { %v1114_v27 = vpop.eup %1113  ;;  %1119 = vlog2.f32 %v634_v20  ;;  %v607_v31 = vadd.f32 1.0, %v1460_v25  ;;  %v647_v58 = vadd.f32 1.0, %v646_v35  ;;  %v620_v62 = vadd.f32 1.0, %v619_v38 }
 0x127   : > { %1121 = vlog2.f32 %v670_v26  ;;  %v661_v28 = vadd.f32 1.0, %v1114_v27  ;;  %v664_v34 = vmul.f32 -0.5, %v1114_v27  ;;  %v674_v48 = vadd.f32 1.0, %v673_v32 }
 0x128   : > { %1123 = vlog2.f32 %v625_v24  ;;  %v610_v0 = vmul.f32 -0.5, %v1460_v25  ;;  %v667_v2 = vand.u32 2147483647, %v1114_v27  ;;  %v657_v10 = vmul.f32 %v1450_v17, %v656_v50 }
 0x129   : > { %1125 = vlog2.f32 %v661_v28  ;;  %v665_v55 = vadd.f32 1.0, %v664_v34  ;;  %v675_v9 = vmul.f32 %v1110_v23, %v674_v48  ;;  %vm677_vm4 = vcmp.lt.f32.partialorder %v676_v54, 0.0004427343 }
 0x12a   : > { %1127 = vlog2.f32 %v616_v29  ;;  %vm1484_vm5 = vcmp.lt.f32.partialorder %v658_v57, 0.0004427343  ;;  %v648_v19 = vmul.f32 %v1452_v18, %v647_v58  ;;  %vm668_vm6 = vcmp.lt.f32.partialorder %v667_v2, 0.0004427343 }
 0x12b   : > { %1129 = vlog2.f32 %v607_v31  ;;  %v666_v13 = vmul.f32 %v1114_v27, %v665_v55  ;;  %vm1491_vm7 = vcmp.lt.f32.partialorder %v649_v3, 0.0004427343  ;;  %v631_v27 = vand.u32 2147483647, %v1448_v16 }
 0x12c   : > { %v639_v18 = vmul.f32 %v1446_v15, %v638_v4  ;;  %v630_v45 = vmul.f32 %v1448_v16, %v629_v6  ;;  %v621_v50 = vmul.f32 %v1456_v21, %v620_v62  ;;  %v553_v54 = vmax.f32 %v1429_v47, 0.0  ;;  %v700_v62 = vpop.permute.xlu0 %699 }
 0x12d   : > { %vm1515_vm9 = vcmp.lt.f32.partialorder %v631_v27, 0.0004427343  ;;  %vm623_vm11 = vcmp.lt.f32.partialorder %v622_v51, 0.0004427343 }
 0x130   : > { %v1116_v46 = vpop.eup %1115 }
 0x131   : > { %v654_v60 = vmul.f32 0.6931472, %v1116_v46  ;;  %v611_v46 = vadd.f32 1.0, %v610_v0 }
 0x132   : > { %v1118_v52 = vpop.eup %1117 }
 0x133   : > { %v1120_v59 = vpop.eup %1119  ;;  %v645_v11 = vmul.f32 0.6931472, %v1118_v52  ;;  %v660_v24 = vsel %vm1484_vm5, %v657_v10, %v654_v60  ;;  %v612_v57 = vmul.f32 %v1460_v25, %v611_v46 }
 0x134   : > { %v1122_v1 = vpop.eup %1121  ;;  %v636_v26 = vmul.f32 0.6931472, %v1120_v59  ;;  %v684_v38 = vadd.f32 %v660_v24, %v556_v36  ;;  %v552_v59 = vmax.f32 %v1422_v41, 0.0 }
 0x135   : > { %v1124_v7 = vpop.eup %1123  ;;  %v672_v8 = vmul.f32 0.6931472, %v1122_v1  ;;  %v651_v31 = vsel %vm1491_vm7, %v648_v19, %v645_v11 }
 0x136   : > { %v1126_v12 = vpop.eup %1125  ;;  %v627_v32 = vmul.f32 0.6931472, %v1124_v7  ;;  %v642_v42 = vsel %vm1503_vm8, %v639_v18, %v636_v26  ;;  %v683_v36 = vadd.f32 %v651_v31, %v555_v40 }
 0x137   : > { %v678_v20 = vsel %vm677_vm4, %v675_v9, %v672_v8  ;;  %v663_v22 = vmul.f32 0.6931472, %v1126_v12  ;;  %v1128_v28 = vpop.eup %1127  ;;  %v682_v40 = vadd.f32 %v642_v42, %v554_v37  ;;  %vm784_vm4 = vcmask 518144  }
 0x138   : > { %v686_v23 = vadd.f32 %v678_v20, %v558_v39  ;;  %v1130_v33 = vpop.eup %1129  ;;  %v618_v15 = vmul.f32 0.6931472, %v1128_v28  ;;  %v633_v16 = vsel %vm1515_vm9, %v630_v45, %v627_v32  ;;  %v691_v58 = vsel %vm563_vm12, %v1436_v56, %v683_v36 }
 0x139   : > { %v669_v29 = vsel %vm668_vm6, %v666_v13, %v663_v22  ;;  %v609_v52 = vmul.f32 0.6931472, %v1130_v33  ;;  %v690_v37 = vsel %vm562_vm14, %v1424_v43, %v682_v40 }
 0x13a   : > { %v694_v34 = vsel %vm566_vm2, %v1440_v63, %v686_v23  ;;  %v685_v35 = vadd.f32 %v669_v29, %v557_v49  ;;  %v613_v49 = vand.u32 2147483647, %v1460_v25  ;;  %v624_v55 = vsel %vm623_vm11, %v621_v50, %v618_v15 }
 0x13b   : > { %1020 = vmatpush3.msra.mxu1 %v694_v34  ;;  %v680_v51 = vadd.f32 %v624_v55, %v552_v59  ;;  %v551_v25 = vmax.f32 %v1426_v44, 0.0  ;;  %vm702_vm2 = vcmask 523264  }
 0x13c   : > { %1021 = vmatprep.subr.mxu1 %v1214_v30  ;;  %v693_v63 = vsel %vm565_vm3, %v1443_v5, %v685_v35  ;;  %v692_v5 = vsel %vm564_vm10, %v1434_v53, %v684_v38  ;;  %v681_v53 = vadd.f32 %v633_v16, %v553_v54  ;;  %vm614_vm13 = vcmp.lt.f32.partialorder %v613_v49, 0.0004427343 }
 0x13d   : > { %1022 = vmatpush3.msra.mxu1 %v693_v63  ;;  %v615_v21 = vsel %vm614_vm13, %v612_v57, %v609_v52  ;;  %v688_v43 = vsel %vm560_vm0, %v1422_v41, %v680_v51  ;;  %vm786_vm3 = vcmask 519171  }
 0x13e   : > { %1023 = vmatprep.subr.mxu1 %v1214_v30  ;;  %v689_v56 = vsel %vm561_vm15, %v1429_v47, %v681_v53  ;;  %v679_v60 = vadd.f32 %v615_v21, %v551_v25 }
 0x13f   : > { %1024 = vmatpush3.msra.mxu1 %v692_v5 }
 0x140   : > { %1025 = vmatprep.subr.mxu1 %v1214_v30  ;;  %v687_v47 = vsel %vm559_vm1, %v1426_v44, %v679_v60 }
 0x141   : > { %1026 = vmatpush3.msra.mxu1 %v691_v58 }
 0x142   : > { %1027 = vmatprep.subr.mxu1 %v1214_v30 }
 0x143   : > { %1028 = vmatpush3.msra.mxu1 %v690_v37 }
 0x144   : > { %1029 = vmatprep.subr.mxu1 %v1214_v30 }
 0x145   : > { %1030 = vmatpush3.msra.mxu1 %v689_v56 }
 0x146   : > { %1031 = vmatprep.subr.mxu1 %v1214_v30 }
 0x147   : > { %1032 = vmatpush3.msra.mxu1 %v688_v43 }
 0x148   : > { %1033 = vmatprep.subr.mxu1 %v1214_v30 }
 0x149   : > { %1034 = vmatpush3.msra.mxu1 %v687_v47 }
 0x14a   : > { %1036 = vmatmul.mubr.msk.f32.vlgmr.msra.gmra.mxu1 %vm702_vm2, %v695_v61 }
 0x20a   : > { %v772_v41 = vpop.f32.mrf.mxu1 }
 0x20b   : > { %v773_v0 = vadd.f32 %v772_v41, %v700_v62 }
 0x20c   : > { %v1037_v1 = vpop.f32.mrf.mxu1 }
 0x20d   : > { %v901_v2 = vmul.f32 -1.442695, %v773_v0  ;;  %787 = vst.msk [vmem:[%s242_s27] sm:$0x8] %vm786_vm3, %v773_v0 }
 0x20f   : > { %1131 = vpow2.f32 %v901_v2 }
 0x21c   : > { %v1132_v3 = vpop.eup %1131 }
 0x21d   : > { %v779_v4 = vadd.f32 1.0, %v1132_v3 }
 0x21f   : > { %1133 = vrcp.f32 %v779_v4 }
 0x22c   : > { %v1134_v30 = vpop.eup %1133 }
 0x22d   : > { %v782_v44 = vmul.f32 1.002, %v1134_v30 }
 0x22f   : > { %v902_v6 = vadd.f32 -0.001, %v782_v44 }
 0x231   : > { %785 = vst.msk [vmem:[%s242_s27] sm:$0x7] %vm784_vm4, %v902_v6 }
 0x232   : > { %1148 = shalt.err (!%p1145_p5)
}
 0x233   : > { %s1149_s15 = scalar_lea.hbm %s801_s10, 64  ;;  %s1153_s24 = scalar_lea.hbm %s1602_s5, 128 }
 0x234   : > { %p1150_p6 = scmp.ne.s32.totalorder %s801_s10, %s1149_s15  ;;  %p1154_p10 = scmp.lt.s32.totalorder %s801_s10, %s1602_s5 }
 0x235   : > { %p1155_p11 = scmp.lt.s32.totalorder %s1153_s24, %s1149_s15 }
 0x236   : > { %p1151_p7 = pnand %p1150_p6, %p1287_p4 }
 0x237   : > { %p1156_p12 = por %p1155_p11, %p1154_p10 }
 0x238   : > { %p1152_p9 = pneg %p1151_p7 }
 0x23a   : > { %p1157_p13 = pnand %p1156_p12, %p1152_p9 }
 0x23c   : > { %1160 = shalt.err (!%p1157_p13)
}
 0x23d   : > { %1039 = dma.vmem_to_hbm [thread:$0]  (%p1287_p4), %s804_s7, 64, %s801_s10, %s789_s11  }
 0x23e PF: > { %p1045_p0 = scmp.ge.s32.totalorder %s1211_s23, 2  ;;  %s815_s29 = sand.u32 1, %s1191_s18  }
 0x23f   : > { %s816_s8 = scalar_lea.sflag [#allocation3], %s815_s29 }
 0x240   : > { %p1042_p1 = pnand %p1045_p0, %p1294_p8 }
 0x242   : > { %p1043_p2 = pneg %p1042_p1 }
 0x244   : > { %1186 = dma.done.wait (%p1043_p2), %s816_s8, 64  }
 0x245   : > { %1188 = vsyncadd (%p1043_p2), %s816_s8, 4294967232  ;;  %s18_s23 = sadd.s32 1, %s1211_s23   ;;  %s1613_s18 = smov %s1195_s19 }
 0x246   : > { %p15_p3 = scmp.ge.s32.totalorder %s18_s23, 4   ;;  %s1614_s19 = smov %s1199_s20 }
 0x247   : > { %s1615_s20 = smov %s1300_s6  ;;  %s1616_s21 = smov %s1207_s22 }
 0x248   : > { %s1617_s22 = smov %s1619_s26  ;;  %17 = sbr.rel (!%p15_p3) target bundleno = 4 (0x4), region = 75 }
 0x24d   :  { %821 = vsyncpa [#allocation3], 1 }
 0x24e   :  { %823 = vsyncpa [#allocation3 + $0x1], 1 }

</bundles_post_ra>
